<compile_context>
chip_gen: v7x
topology: tpu7x:2x2x1
jax: 0.10.0
libtpu: 0.0.40
codegen_flags: <defaults>
</compile_context>

<pallas_src>
import functools

import jax
import jax.numpy as jnp
from jax import lax
from jax.experimental import pallas as pl
from jax.experimental.pallas import tpu as pltpu

F = 45  # nn.Linear(45, 1)


def _round_up(n, m):
    return ((n + m - 1) // m) * m


def _linear_kernel(x_ref, w_ref, b_ref, o_ref, *, apply_sigmoid):
    # x_ref: (tb, 45) VMEM batch tile (batch rows on sublanes)
    # w_ref: (1, 45)  VMEM weight row (resident; same block every grid step)
    # b_ref: (1,)     SMEM scalar bias
    # o_ref: (1, tb)  VMEM lane-dense output row (batch on lanes)
    #
    # NT matmul on the MXU: row[0, j] = sum_k w[0, k] * x[j, k]
    # (same contraction pattern as q @ k^T in flash attention). The reduction
    # over the 45 features happens inside the systolic array — no XLU
    # lane-reduce — and the result comes out with the batch on lanes, i.e.
    # exactly the lane-dense layout the output store wants.
    row = lax.dot_general(
        w_ref[...].astype(jnp.float32),
        x_ref[...].astype(jnp.float32),
        dimension_numbers=(((1,), (1,)), ((), ())),
        preferred_element_type=jnp.float32,
    )  # (1, tb) f32
    row = row + b_ref[0]
    if apply_sigmoid:
        row = jax.nn.sigmoid(row)  # EUP slot; effectively free on an HBM-bound kernel
    o_ref[...] = row.astype(o_ref.dtype)


def _linear_pallas(x, weight, bias, *, apply_sigmoid, block_b=8192):
    """y = x @ weight.T + bias (optionally sigmoid).  x: (B, 45) -> (B, 1)."""
    B, feat = x.shape
    assert feat == F, f"expected {F} input features, got {feat}"
    assert weight.shape == (1, F), f"expected weight shape (1, {F}), got {weight.shape}"
    assert bias.shape == (1,), f"expected bias shape (1,), got {bias.shape}"

    # Batch tile: multiple of 128 so the (1, tb) output block is lane-dense
    # (unmasked stores + contiguous writeback). Padded VMEM cost per x buffer
    # is tb * 128 lanes * 4 B (the 45-wide feature dim pads to 128 lanes), so
    # the default tb = 8192 uses ~4 MiB/buffer, ~8.5 MiB double-buffered total.
    tb = max(128, (min(block_b, _round_up(B, 128)) // 128) * 128)
    nt = pl.cdiv(B, tb)
    bp = nt * tb  # lane-padded output length; extra lanes sliced off below

    kernel = functools.partial(_linear_kernel, apply_sigmoid=apply_sigmoid)
    out = pl.pallas_call(
        kernel,
        # Lane-dense output slab: one (1, bp) row with the batch on lanes.
        out_shape=jax.ShapeDtypeStruct((1, bp), jnp.float32),
        grid_spec=pltpu.PrefetchScalarGridSpec(
            num_scalar_prefetch=0,
            grid=(nt,),
            in_specs=[
                pl.BlockSpec((tb, F), lambda i: (i, 0)),              # streamed batch tiles
                pl.BlockSpec((1, F), lambda i: (0, 0)),               # resident weight row
                pl.BlockSpec(memory_space=pltpu.MemorySpace.SMEM),    # bias scalar
            ],
            out_specs=pl.BlockSpec((1, tb), lambda i: (0, i)),
        ),
        compiler_params=pltpu.CompilerParams(
            # Embarrassingly parallel over the batch: lets v7x shard grid steps
            # across its two TensorCores; harmless on single-TC v5e/v6e.
            dimension_semantics=("parallel",),
        ),
    )(x, weight, bias)

    # Layout plumbing only: drop padded lanes, present as (B, 1) like nn.Linear.
    return out[0, :B].reshape(B, 1)


def small_model_forward(x, weight, bias, *, block_b=8192):
    """SmallModel.forward: lin1(x), no activation."""
    return _linear_pallas(x, weight, bias, apply_sigmoid=False, block_b=block_b)


def predict_proba(x, weight, bias, *, block_b=8192):
    """SmallModel.predict_proba: sigmoid(lin1(x)), fused inside the kernel."""
    # TODO(synk): the torch<->numpy conversion in the original predict_proba is
    # host-side plumbing with no kernel equivalent; only the math is ported.
    return _linear_pallas(x, weight, bias, apply_sigmoid=True, block_b=block_b)


if __name__ == "__main__":
    key = jax.random.PRNGKey(0)
    kx, kx2, kw, kb = jax.random.split(key, 4)

    # Deterministic init mimicking nn.Linear(45, 1): uniform(-1/sqrt(45), 1/sqrt(45)).
    bound = 1.0 / (F ** 0.5)
    weight = jax.random.uniform(kw, (1, F), minval=-bound, maxval=bound,
                                dtype=jnp.float32)   # PyTorch lin1.weight layout
    bias = jax.random.uniform(kb, (1,), minval=-bound, maxval=bound,
                              dtype=jnp.float32)     # PyTorch lin1.bias layout

    # Case 1: tiny batch (single tile).
    B = 8
    x = jax.random.normal(kx, (B, F), dtype=jnp.float32)
    out = jax.block_until_ready(small_model_forward(x, weight, bias))
    ref = x @ weight.T + bias
    assert out.shape == (B, 1)
    assert jnp.allclose(out, ref, atol=2e-3, rtol=2e-3), "forward mismatch vs reference"

    probs = jax.block_until_ready(predict_proba(x, weight, bias))
    ref_p = jax.nn.sigmoid(ref)
    assert probs.shape == (B, 1)
    assert jnp.allclose(probs, ref_p, atol=2e-3, rtol=2e-3), "predict_proba mismatch vs reference"

    # Case 2: multi-tile path with a ragged last tile (small block_b keeps the test cheap).
    B2 = 300
    x2 = jax.random.normal(kx2, (B2, F), dtype=jnp.float32)
    out2 = jax.block_until_ready(small_model_forward(x2, weight, bias, block_b=128))
    ref2 = x2 @ weight.T + bias
    assert out2.shape == (B2, 1)
    assert jnp.allclose(out2, ref2, atol=2e-3, rtol=2e-3), "multi-tile forward mismatch"

    print("KERNEL_OK")
</pallas_src>

<mosaic_0001>
module attributes {stable_mosaic.version = 11 : i64} {
  func.func @_linear_kernel(%arg0: i32, %arg1: memref<128x45xf32, #tpu.memory_space<vmem>>, %arg2: memref<1x45xf32, #tpu.memory_space<vmem>>, %arg3: memref<1xf32, #tpu.memory_space<smem>>, %arg4: memref<1x128xf32, #tpu.memory_space<vmem>>) attributes {dimension_semantics = [#tpu.dimension_semantics<parallel>], iteration_bounds = array<i64: 1>, scalar_prefetch = 0 : i64, scratch_operands = 0 : i64, tpu.core_type = #tpu.core_type<tc>, window_params = [{transform_indices = @transform_0, window_bounds = array<i64: 128, 45>}, {pipeline_mode = #tpu.pipeline_mode<synchronous>, transform_indices = @transform_1, window_bounds = array<i64: 1, 45>}, {transform_indices = @transform_2, window_bounds = array<i64: 1>}, {transform_indices = @transform_3, window_bounds = array<i64: 1, 128>}]} {
    %c0 = arith.constant 0 : index
    %c0_0 = arith.constant 0 : index
    %0 = vector.load %arg2[%c0, %c0_0] : memref<1x45xf32, #tpu.memory_space<vmem>>, vector<1x45xf32>
    %c0_1 = arith.constant 0 : index
    %c0_2 = arith.constant 0 : index
    %1 = vector.load %arg1[%c0_1, %c0_2] : memref<128x45xf32, #tpu.memory_space<vmem>>, vector<128x45xf32>
    %cst = arith.constant dense<0.000000e+00> : vector<1x128xf32>
    %2 = tpu.matmul %0, %1, %cst {dimension_numbers = #tpu.dot_dimension_numbers<[1], [1], [0], [0], [0, 0, 1, 0], [], []>} : vector<1x45xf32>, vector<128x45xf32>, vector<1x128xf32> -> vector<1x128xf32>
    %c0_3 = arith.constant 0 : index
    %3 = memref.load %arg3[%c0_3] : memref<1xf32, #tpu.memory_space<smem>>
    %4 = vector.broadcast %3 : f32 to vector<1x128xf32>
    %5 = arith.addf %2, %4 : vector<1x128xf32>
    %c0_4 = arith.constant 0 : index
    %c0_5 = arith.constant 0 : index
    %6 = vector.load %arg4[%c0_4, %c0_5] : memref<1x128xf32, #tpu.memory_space<vmem>>, vector<1x128xf32>
    tpu.vector_store %arg4[%c0_4, %c0_5], %5 {strides = array<i32>} : memref<1x128xf32, #tpu.memory_space<vmem>>, vector<1x128xf32>,
    return
  }
  func.func @transform_0(%arg0: i32) -> (i32, i32) {
    %c0_i32 = arith.constant 0 : i32
    %c0_i32_0 = arith.constant 0 : i32
    return %arg0, %c0_i32 : i32, i32
  }
  func.func @transform_1(%arg0: i32) -> (i32, i32) {
    %c0_i32 = arith.constant 0 : i32
    %c0_i32_0 = arith.constant 0 : i32
    %c0_i32_1 = arith.constant 0 : i32
    return %c0_i32, %c0_i32_0 : i32, i32
  }
  func.func @transform_2(%arg0: i32) -> i32 {
    %c0_i32 = arith.constant 0 : i32
    %c0_i32_0 = arith.constant 0 : i32
    return %c0_i32 : i32
  }
  func.func @transform_3(%arg0: i32) -> (i32, i32) {
    %c0_i32 = arith.constant 0 : i32
    %c0_i32_0 = arith.constant 0 : i32
    return %c0_i32, %arg0 : i32, i32
  }
}

</mosaic_0001>

<bundles_post_ra>
// kernel: tpu_custom_call.1
= control target key start
LH: loop header
LB: loop body
LE: loop exit
PB: predicated region body
PF: predicated region fallthrough
CT: control target
= control target key end

     0   :  { %9 = vsyncpa [#allocation4], 0  ;;  %s423_s0 = inlined_call_operand.hbm [shape: f32[8,45], index: 0, kind: input, shape index: {}]   ;;  %s424_s1 = inlined_call_operand.vmem [shape: f32[1,45], index: 1, kind: input, shape index: {}]   ;;  %s425_s2 = inlined_call_operand.<no memory space> [shape: f32[1], index: 2, kind: input, shape index: {}]   ;;  %s426_s3 = inlined_call_operand.hbm [shape: f32[1,128], index: 3, kind: output, shape index: {}]  }
   0x1   :  { %10 = vsyncpa [#allocation5], 0 }
   0x2   :  { %15 = vsyncadd [#allocation4], 1920  ;;  %s343_s12 = smov [#allocation3]   ;;  %s295_s16 = scalar_lea.hbm %s423_s0, 128 }
   0x3   :  { %s16_s13 = sshll.u32 %s343_s12, 4  ;;  %p296_p0 = scmp.ne.s32.totalorder %s423_s0, %s295_s16  ;;  %s17_s13 = int_to_ptr.vmem [resolvable:$true] %s16_s13 }
   0x4   :  { %p299_p1 = scmp.lt.u32.totalorder %s295_s16, %s423_s0 }
   0x6   :  { %p301_p2 = pnand %p299_p1, %p296_p0 }
   0x8   :  { %304 = shalt.err (!%p301_p2)
}
   0x9   :  { %s305_s21 = scalar_lea.vmem %s17_s13, 128  ;;  %s309_s22 = scalar_lea.vmem %s17_s13, 2048 }
   0xa   :  { %p306_p3 = scmp.ne.s32.totalorder %s17_s13, %s305_s21  ;;  %p310_p4 = scmp.lt.s32.totalorder %s17_s13, %s17_s13 }
   0xb   :  { %p311_p5 = scmp.lt.s32.totalorder %s309_s22, %s305_s21 }
   0xd   :  { %p312_p6 = por %p311_p5, %p310_p4 }
   0xf   :  { %p313_p7 = pnand %p312_p6, %p306_p3 }
  0x11   :  { %316 = shalt.err (!%p313_p7)
}
  0x12   :  { %s344_s23 = smov 128   ;;  %s345_s24 = smov 8  }
  0x13   :  { %22 = dma.hbm_to_vmem [thread:$0]  %s423_s0, 128, %s17_s13, [#allocation4], %s344_s23, %s344_s23, %s345_s24  }
  0x14   :  { %339 = dma.done.wait [#allocation4], 2048  }
  0x15   :  { %340 = vsyncadd [#allocation4], 4294965248  ;;  %v346_v0 = vmov 0.0|0.0   ;;  %vm347_vm0 = vmmov 0   ;;  %v348_v1 = vmov 0.0   ;;  %vm49_vm1 = vcmask 367616  }
  0x16   :  { %256 = vmatprep.subr.bf16.mxu0 %v346_v0  ;;  %253 = vmatprep.mubr.msk.f32.mxu0 %vm347_vm0, %v348_v1  ;;  %v31_v2 = vld [vmem:[#allocation3] sm:$0xff]  ;;  %v32_v3 = vld [vmem:[#allocation3 + $0x8] sm:$0xff]  ;;  %vm384_vm2 = vmpackc.low %vm49_vm1, %vm49_vm1  ;;  %v48_v28 = vstv %s425_s2  ;;  %s349_s30 = smov [#allocation6]  }
  0x17   :  { %v257_v5 = vpack.c.bf16 %v32_v3, %v31_v2  ;;  %v33_v6 = vld [vmem:[#allocation3 + $0x10] sm:$0xff]  ;;  %v34_v7 = vld [vmem:[#allocation3 + $0x18] sm:$0xff]  ;;  %v35_v9 = vld [vmem:[#allocation3 + $0x20] sm:$0xff]  ;;  %s178_s4 = sshll.u32 %s349_s30, 4  ;;  %s179_s4 = int_to_ptr.vmem [resolvable:$true] %s178_s4 }
  0x18   :  { %v261_v8 = vpack.c.bf16 %v34_v7, %v33_v6  ;;  %v36_v10 = vld [vmem:[#allocation3 + $0x28] sm:$0xff]  ;;  %v37_v12 = vld [vmem:[#allocation3 + $0x30] sm:$0xff]  ;;  %v38_v13 = vld [vmem:[#allocation3 + $0x38] sm:$0xff]  ;;  %s317_s5 = scalar_lea.vmem %s179_s4, 16  ;;  %s321_s6 = scalar_lea.vmem %s179_s4, 32 }
  0x19   :  { %259 = vmatpush3.bf16.xpose.msk.msra.mxu0 %vm384_vm2, %v257_v5  ;;  %v265_v11 = vpack.c.bf16 %v36_v10, %v35_v9  ;;  %v269_v14 = vpack.c.bf16 %v38_v13, %v37_v12  ;;  %v39_v15 = vld [vmem:[#allocation3 + $0x40] sm:$0xff]  ;;  %v40_v16 = vld [vmem:[#allocation3 + $0x48] sm:$0xff]  ;;  %v41_v18 = vld [vmem:[#allocation3 + $0x50] sm:$0xff]  ;;  %p318_p8 = scmp.ne.s32.totalorder %s179_s4, %s317_s5  ;;  %p322_p9 = scmp.lt.s32.totalorder %s179_s4, %s179_s4 }
  0x1a   :  { %260 = vmatprep.subr.bf16.mxu0 %v346_v0  ;;  %v273_v17 = vpack.c.bf16 %v40_v16, %v39_v15  ;;  %v42_v19 = vld [vmem:[#allocation3 + $0x58] sm:$0xff]  ;;  %v43_v21 = vld [vmem:[#allocation3 + $0x60] sm:$0xff]  ;;  %v44_v22 = vld [vmem:[#allocation3 + $0x68] sm:$0xff]  ;;  %p323_p10 = scmp.lt.s32.totalorder %s321_s6, %s317_s5 }
  0x1b   :  { %v277_v20 = vpack.c.bf16 %v42_v19, %v41_v18  ;;  %v281_v23 = vpack.c.bf16 %v44_v22, %v43_v21  ;;  %v45_v24 = vld [vmem:[#allocation3 + $0x70] sm:$0xff]  ;;  %v46_v25 = vld [vmem:[#allocation3 + $0x78] sm:$0xff]  ;;  %v30_v27 = vld [vmem:[%s424_s1] sm:$0x1] }
  0x1c   :  { %v285_v26 = vpack.c.bf16 %v46_v25, %v45_v24  ;;  %p324_p11 = por %p323_p10, %p322_p9 }
  0x1e   :  { %p325_p12 = pnand %p324_p11, %p318_p8 }
  0x21   :  { %263 = vmatpush3.bf16.xpose.msk.msra.mxu0 %vm384_vm2, %v261_v8 }
  0x22   :  { %264 = vmatprep.subr.bf16.mxu0 %v346_v0 }
  0x29   :  { %267 = vmatpush3.bf16.xpose.msk.msra.mxu0 %vm384_vm2, %v265_v11 }
  0x2a   :  { %268 = vmatprep.subr.bf16.mxu0 %v346_v0 }
  0x31   :  { %271 = vmatpush3.bf16.xpose.msk.msra.mxu0 %vm384_vm2, %v269_v14 }
  0x32   :  { %272 = vmatprep.subr.bf16.mxu0 %v346_v0 }
  0x39   :  { %275 = vmatpush3.bf16.xpose.msk.msra.mxu0 %vm384_vm2, %v273_v17 }
  0x3a   :  { %276 = vmatprep.subr.bf16.mxu0 %v346_v0 }
  0x41   :  { %279 = vmatpush3.bf16.xpose.msk.msra.mxu0 %vm384_vm2, %v277_v20 }
  0x42   :  { %280 = vmatprep.subr.bf16.mxu0 %v346_v0 }
  0x49   :  { %283 = vmatpush3.bf16.xpose.msk.msra.mxu0 %vm384_vm2, %v281_v23 }
  0x4a   :  { %284 = vmatprep.subr.bf16.mxu0 %v346_v0 }
  0x51   :  { %287 = vmatpush3.bf16.xpose.msk.msra.mxu0 %vm384_vm2, %v285_v26 }
  0x58   :  { %254 = vmatmul.mubr.msk.f32.vlgmr.msra.gmra.mrb[0].mxu0 %vm49_vm1, %v30_v27 }
 0x12b   :  { %v167_v29 = vpop.f32.mrb[0].mxu0 }
 0x12c   :  { %v168_v30 = vadd.f32 %v167_v29, %v48_v28  ;;  %v255_v31 = vpop.f32.mrb[1].mxu0 }
 0x12e   :  { %171 = vst [vmem:[#allocation6] sm:$0x1] %v168_v30 }
 0x12f   :  { %328 = shalt.err (!%p325_p12)
}
 0x130   :  { %s329_s8 = scalar_lea.hbm %s426_s3, 16 }
 0x131   :  { %p330_p13 = scmp.ne.s32.totalorder %s426_s3, %s329_s8  ;;  %p333_p0 = scmp.lt.u32.totalorder %s329_s8, %s426_s3 }
 0x133   :  { %p335_p1 = pnand %p333_p0, %p330_p13 }
 0x135   :  { %338 = shalt.err (!%p335_p1)
}
 0x136   :  { %181 = dma.vmem_to_hbm [thread:$0]  %s179_s4, 16, %s426_s3, [#allocation5]  }
 0x137   :  { %341 = dma.done.wait [#allocation5], 16  }
 0x138   :  { %342 = vsyncadd [#allocation5], 4294967280 }
 0x139   :  { %185 = vsyncpa [#allocation4], 1 }
 0x13a   :  { %186 = vsyncpa [#allocation5], 1 }

</bundles_post_ra>
